<compile_context>
chip_gen: v7x
topology: tpu7x:2x2x1
jax: 0.10.0
libtpu: 0.0.40
codegen_flags: <defaults>
</compile_context>

<pallas_src>
import math
import jax
import jax.numpy as jnp
from jax.experimental import pallas as pl
from jax.experimental.pallas import tpu as pltpu


def _critic_kernel(x_ref, w_ref, b_ref, o_ref):
    # x_ref: (TB, H)   w_ref: (H, 2)   b_ref: (1, 2) f32   o_ref: (TB, 2)
    # Default dot precision -> single-pass bf16 MXU schedule with f32
    # accumulation; do NOT request HIGH/HIGHEST (would flip v7x to MXU-bound).
    acc = jnp.dot(x_ref[...], w_ref[...], preferred_element_type=jnp.float32)
    o_ref[...] = (acc + b_ref[...]).astype(o_ref.dtype)


def _vmem_capacity_bytes():
    try:
        info = pltpu.get_tpu_info()
        return getattr(info, "vmem_capacity_bytes", None)
    except Exception:
        return None


def _pick_tiling(B, H, dtype):
    """Returns (batch_tile, vmem_limit_bytes, use_triple_buffer)."""
    itemsize = jnp.dtype(dtype).itemsize
    # Sublane multiple for this dtype (sub-32-bit dtypes pack along sublanes).
    sub = {4: 8, 2: 16, 1: 32}.get(itemsize, 8)
    h_pad = pl.cdiv(H, 128) * 128

    vmem_cap = _vmem_capacity_bytes()
    if vmem_cap is not None and vmem_cap >= 100 * 1024 * 1024:
        # v5e / v6e: 128 MiB physical VMEM, single TensorCore.
        per_tile_budget = 28 * 1024 * 1024
        vmem_limit = 96 * 1024 * 1024
        min_steps = 2
    else:
        # v7x (64 MiB VMEM, 2 TensorCores) or unknown: conservative budgets.
        per_tile_budget = 14 * 1024 * 1024
        vmem_limit = 44 * 1024 * 1024
        min_steps = 6

    if B <= sub:
        return B, vmem_limit, False  # single full-array block

    # VMEM bytes per batch row: lane-padded x row plus the output row, which is
    # lane-padded from 2 to 128 in VMEM (64x its logical width) and must count.
    row_bytes = (h_pad + 128) * itemsize
    tb = per_tile_budget // max(1, row_bytes)

    # Keep the grid at >= min_steps so the DMA pipeline has work to overlap
    # with and (on v7x) both TensorCores of the "parallel" batch axis get
    # multiple steps each.
    if B > min_steps * sub:
        tb = min(tb, max(sub, B // min_steps))

    tb = max(sub, min(tb, B))
    if tb < B:
        tb = (tb // sub) * sub  # dtype-correct sublane rounding

    # If each streamed x tile sits far below the budget, triple-buffer it to
    # hide per-step DMA setup (costs one extra tile of VMEM).
    n_steps = pl.cdiv(B, tb)
    use_triple = (n_steps >= 3) and (3 * tb * row_bytes < per_tile_budget)
    return int(tb), int(vmem_limit), bool(use_triple)


def critic_forward(base_output, w_reward, b_reward, w_rating, b_rating):
    """Pallas equivalent of Critic.forward.

    base_output: (B, H) float32 or bfloat16
    w_reward, w_rating: PyTorch-style Linear weights of shape (1, H)
    b_reward, b_rating: biases of shape (1,)
    Returns (value_reward, value_rating), each (B, 1).
    """
    x = jnp.asarray(base_output)
    B, H = x.shape
    dtype = x.dtype

    # Fuse both heads: one (H, 2) weight, one (1, 2) f32 bias.
    wr = jnp.asarray(w_reward, dtype).reshape(1, H)
    wt = jnp.asarray(w_rating, dtype).reshape(1, H)
    w_cat = jnp.concatenate([wr, wt], axis=0).T  # (H, 2)
    b_cat = jnp.concatenate(
        [jnp.asarray(b_reward, jnp.float32).reshape(1),
         jnp.asarray(b_rating, jnp.float32).reshape(1)]
    ).reshape(1, 2)

    TB, vmem_limit, use_triple = _pick_tiling(B, H, dtype)
    grid = (pl.cdiv(B, TB),)

    x_spec = pl.BlockSpec((TB, H), lambda i: (i, 0))
    if use_triple:
        try:  # triple-buffer only the streamed operand; weights/bias stay default
            x_spec = pl.BlockSpec((TB, H), lambda i: (i, 0),
                                  pipeline_mode=pl.Buffered(3))
        except (TypeError, AttributeError):
            pass

    out = pl.pallas_call(
        _critic_kernel,
        out_shape=jax.ShapeDtypeStruct((B, 2), dtype),
        grid=grid,
        in_specs=[
            x_spec,                                   # streamed activations
            pl.BlockSpec((H, 2), lambda i: (0, 0)),   # resident fused weights
            pl.BlockSpec((1, 2), lambda i: (0, 0)),   # resident fused biases
        ],
        # Keep the logical output at N=2: padding to 128 lanes would only add
        # HBM write traffic (output is B*8 bytes vs B*H*itemsize input bytes).
        out_specs=pl.BlockSpec((TB, 2), lambda i: (i, 0)),
        compiler_params=pltpu.CompilerParams(
            dimension_semantics=("parallel",),        # shard batch grid over v7x TCs
            vmem_limit_bytes=vmem_limit,              # generation-aware scoped limit
        ),
    )(x, w_cat, b_cat)

    value_reward = out[:, 0:1]
    value_rating = out[:, 1:2]
    return value_reward, value_rating


def _reference(base_output, w_reward, b_reward, w_rating, b_rating):
    xf = base_output.astype(jnp.float32)
    return (xf @ w_reward.astype(jnp.float32).T + b_reward,
            xf @ w_rating.astype(jnp.float32).T + b_rating)


if __name__ == "__main__":
    key = jax.random.PRNGKey(0)

    # --- primary small-shape check (matches the module's toy sizes) ---
    B, H = 2, 32  # hidden_size2 = 32
    k_x, k_wr, k_br, k_wt, k_bt = jax.random.split(key, 5)
    base_output = jax.random.normal(k_x, (B, H), dtype=jnp.float32)

    bound = 1.0 / math.sqrt(H)
    w_reward = jax.random.uniform(k_wr, (1, H), jnp.float32, -bound, bound)
    b_reward = jax.random.uniform(k_br, (1,), jnp.float32, -bound, bound)
    w_rating = jax.random.uniform(k_wt, (1, H), jnp.float32, -bound, bound)
    b_rating = jax.random.uniform(k_bt, (1,), jnp.float32, -bound, bound)

    value_reward, value_rating = critic_forward(
        base_output, w_reward, b_reward, w_rating, b_rating
    )
    jax.block_until_ready((value_reward, value_rating))

    ref_reward, ref_rating = _reference(
        base_output, w_reward, b_reward, w_rating, b_rating
    )
    assert value_reward.shape == (B, 1) and value_rating.shape == (B, 1)
    assert jnp.allclose(value_reward, ref_reward, atol=1e-5)
    assert jnp.allclose(value_rating, ref_rating, atol=1e-5)

    # --- secondary f32 check exercising the tiled / ragged-last-block path ---
    B2, H2 = 2056, 512
    k2x, k2wr, k2br, k2wt, k2bt = jax.random.split(jax.random.PRNGKey(1), 5)
    x2 = jax.random.normal(k2x, (B2, H2), dtype=jnp.float32)
    bound2 = 1.0 / math.sqrt(H2)
    wr2 = jax.random.uniform(k2wr, (1, H2), jnp.float32, -bound2, bound2)
    br2 = jax.random.uniform(k2br, (1,), jnp.float32, -bound2, bound2)
    wt2 = jax.random.uniform(k2wt, (1, H2), jnp.float32, -bound2, bound2)
    bt2 = jax.random.uniform(k2bt, (1,), jnp.float32, -bound2, bound2)

    vr2, vt2 = critic_forward(x2, wr2, br2, wt2, bt2)
    jax.block_until_ready((vr2, vt2))
    rr2, rt2 = _reference(x2, wr2, br2, wt2, bt2)
    assert jnp.allclose(vr2, rr2, atol=1e-4)
    assert jnp.allclose(vt2, rt2, atol=1e-4)

    # --- bf16 check exercising the 16-row sublane rounding + ragged tile ---
    B3, H3 = 200, 256
    k3x, k3wr, k3br, k3wt, k3bt = jax.random.split(jax.random.PRNGKey(2), 5)
    x3 = jax.random.normal(k3x, (B3, H3), dtype=jnp.float32).astype(jnp.bfloat16)
    bound3 = 1.0 / math.sqrt(H3)
    wr3 = jax.random.uniform(k3wr, (1, H3), jnp.float32, -bound3, bound3)
    br3 = jax.random.uniform(k3br, (1,), jnp.float32, -bound3, bound3)
    wt3 = jax.random.uniform(k3wt, (1, H3), jnp.float32, -bound3, bound3)
    bt3 = jax.random.uniform(k3bt, (1,), jnp.float32, -bound3, bound3)

    vr3, vt3 = critic_forward(x3, wr3, br3, wt3, bt3)
    jax.block_until_ready((vr3, vt3))
    rr3, rt3 = _reference(
        x3, wr3.astype(jnp.bfloat16), br3, wt3.astype(jnp.bfloat16), bt3
    )
    assert vr3.shape == (B3, 1) and vt3.shape == (B3, 1)
    assert jnp.allclose(vr3.astype(jnp.float32), rr3, atol=1e-1)
    assert jnp.allclose(vt3.astype(jnp.float32), rt3, atol=1e-1)

    print("KERNEL_OK")
</pallas_src>

<mosaic_0001>
module attributes {stable_mosaic.version = 11 : i64} {
  func.func @_critic_kernel(%arg0: i32, %arg1: memref<2x32xf32, #tpu.memory_space<vmem>>, %arg2: memref<32x2xf32, #tpu.memory_space<vmem>>, %arg3: memref<1x2xf32, #tpu.memory_space<vmem>>, %arg4: memref<2x2xf32, #tpu.memory_space<vmem>>) attributes {dimension_semantics = [#tpu.dimension_semantics<parallel>], iteration_bounds = array<i64: 1>, scalar_prefetch = 0 : i64, scratch_operands = 0 : i64, tpu.core_type = #tpu.core_type<tc>, window_params = [{transform_indices = @transform_0, window_bounds = array<i64: 2, 32>}, {pipeline_mode = #tpu.pipeline_mode<synchronous>, transform_indices = @transform_1, window_bounds = array<i64: 32, 2>}, {pipeline_mode = #tpu.pipeline_mode<synchronous>, transform_indices = @transform_2, window_bounds = array<i64: 1, 2>}, {transform_indices = @transform_3, window_bounds = array<i64: 2, 2>}]} {
    %c0 = arith.constant 0 : index
    %c0_0 = arith.constant 0 : index
    %0 = vector.load %arg1[%c0, %c0_0] : memref<2x32xf32, #tpu.memory_space<vmem>>, vector<2x32xf32>
    %c0_1 = arith.constant 0 : index
    %c0_2 = arith.constant 0 : index
    %1 = vector.load %arg2[%c0_1, %c0_2] : memref<32x2xf32, #tpu.memory_space<vmem>>, vector<32x2xf32>
    %cst = arith.constant dense<0.000000e+00> : vector<2x2xf32>
    %2 = tpu.matmul %0, %1, %cst {dimension_numbers = #tpu.dot_dimension_numbers<[1], [0], [0], [1], [0, 0, 1, 1], [], []>} : vector<2x32xf32>, vector<32x2xf32>, vector<2x2xf32> -> vector<2x2xf32>
    %c0_3 = arith.constant 0 : index
    %c0_4 = arith.constant 0 : index
    %3 = vector.load %arg3[%c0_3, %c0_4] : memref<1x2xf32, #tpu.memory_space<vmem>>, vector<1x2xf32>
    %4 = vector.broadcast %3 : vector<1x2xf32> to vector<2x2xf32>
    %5 = arith.addf %2, %4 : vector<2x2xf32>
    %c0_5 = arith.constant 0 : index
    %c0_6 = arith.constant 0 : index
    %6 = vector.load %arg4[%c0_5, %c0_6] : memref<2x2xf32, #tpu.memory_space<vmem>>, vector<2x2xf32>
    tpu.vector_store %arg4[%c0_5, %c0_6], %5 {strides = array<i32>} : memref<2x2xf32, #tpu.memory_space<vmem>>, vector<2x2xf32>,
    return
  }
  func.func @transform_0(%arg0: i32) -> (i32, i32) {
    %c0_i32 = arith.constant 0 : i32
    %c0_i32_0 = arith.constant 0 : i32
    return %arg0, %c0_i32 : i32, i32
  }
  func.func @transform_1(%arg0: i32) -> (i32, i32) {
    %c0_i32 = arith.constant 0 : i32
    %c0_i32_0 = arith.constant 0 : i32
    %c0_i32_1 = arith.constant 0 : i32
    return %c0_i32, %c0_i32_0 : i32, i32
  }
  func.func @transform_2(%arg0: i32) -> (i32, i32) {
    %c0_i32 = arith.constant 0 : i32
    %c0_i32_0 = arith.constant 0 : i32
    %c0_i32_1 = arith.constant 0 : i32
    return %c0_i32, %c0_i32_0 : i32, i32
  }
  func.func @transform_3(%arg0: i32) -> (i32, i32) {
    %c0_i32 = arith.constant 0 : i32
    %c0_i32_0 = arith.constant 0 : i32
    return %arg0, %c0_i32 : i32, i32
  }
}

</mosaic_0001>

<bundles_post_ra>
// kernel: tpu_custom_call.1
= control target key start
LH: loop header
LB: loop body
LE: loop exit
PB: predicated region body
PF: predicated region fallthrough
CT: control target
= control target key end

     0   :  { %v169_v3 = vmov 0.0|0.0   ;;  %vm170_vm0 = vmmov 0   ;;  %v171_v6 = vmov 0.0   ;;  %s223_s0 = inlined_call_operand.vmem [shape: f32[2,32], index: 0, kind: input, shape index: {}]   ;;  %s224_s1 = inlined_call_operand.vmem [shape: f32[32,2], index: 1, kind: input, shape index: {}]   ;;  %s225_s2 = inlined_call_operand.vmem [shape: f32[1,2], index: 2, kind: input, shape index: {}]   ;;  %s226_s3 = inlined_call_operand.hbm [shape: f32[2,2], index: 3, kind: output, shape index: {}]  }
   0x1   :  { %v16_v0 = vld [vmem:[%s224_s1] sm:$0xff]  ;;  %v17_v1 = vld [vmem:[%s224_s1 + $0x8] sm:$0xff]  ;;  %v18_v2 = vld [vmem:[%s224_s1 + $0x10] sm:$0xff]  ;;  %135 = vmatprep.subr.bf16.mxu0 %v169_v3  ;;  %132 = vmatprep.mubr.msk.f32.mxu0 %vm170_vm0, %v171_v6 }
   0x2   :  { %v136_v4 = vpack.c.bf16 %v17_v1, %v16_v0  ;;  %v19_v5 = vld [vmem:[%s224_s1 + $0x18] sm:$0xff] }
   0x3   :  { %8 = vsyncpa [#allocation3], 0  ;;  %v139_v7 = vpack.c.bf16 %v19_v5, %v18_v2  ;;  %v15_v8 = vld [vmem:[%s223_s0] sm:$0x3]  ;;  %vm27_vm1 = vcmask 261120   ;;  %s172_s24 = smov [#allocation2]  }
   0x4   :  { %137 = vmatpush3.bf16.msra.mxu0 %v136_v4  ;;  %v117_v9 = vld [vmem:[%s225_s2] ss:$0 sm:$0xff]  ;;  %s109_s1 = sshll.u32 %s172_s24, 4  ;;  %vm101_vm2 = vcmask 9216   ;;  %s110_s1 = int_to_ptr.vmem [resolvable:$true] %s109_s1 }
   0x5   :  { %138 = vmatprep.subr.bf16.mxu0 %v169_v3  ;;  %s145_s25 = scalar_lea.vmem %s110_s1, 32  ;;  %p150_p1 = scmp.lt.s32.totalorder %s110_s1, %s110_s1 }
   0x6   :  { %p146_p0 = scmp.ne.s32.totalorder %s110_s1, %s145_s25  ;;  %p151_p2 = scmp.lt.s32.totalorder %s145_s25, %s145_s25 }
   0x8   :  { %140 = vmatpush3.bf16.msra.mxu0 %v139_v7  ;;  %p152_p3 = por %p151_p2, %p150_p1 }
   0xa   :  { %p153_p4 = pnand %p152_p3, %p146_p0 }
   0xb   :  { %133 = vmatmul.mubr.msk.f32.vlgmr.msra.gmra.mrb[0].mxu0 %vm27_vm1, %v15_v8 }
  0xde   :  { %v97_v10 = vpop.f32.mrb[0].mxu0 }
  0xdf   :  { %v98_v11 = vadd.f32 %v117_v9, %v97_v10  ;;  %v134_v12 = vpop.f32.mrb[1].mxu0 }
  0xe1   :  { %102 = vst.msk [vmem:[#allocation2] sm:$0x3] %vm101_vm2, %v98_v11 }
  0xe2   :  { %156 = shalt.err (!%p153_p4)
}
  0xe3   :  { %s157_s27 = scalar_lea.hbm %s226_s3, 32 }
  0xe4   :  { %p158_p5 = scmp.ne.s32.totalorder %s226_s3, %s157_s27  ;;  %p161_p6 = scmp.lt.u32.totalorder %s157_s27, %s226_s3 }
  0xe6   :  { %p163_p7 = pnand %p161_p6, %p158_p5 }
  0xe8   :  { %166 = shalt.err (!%p163_p7)
}
  0xe9   :  { %112 = dma.vmem_to_hbm [thread:$0]  %s110_s1, 32, %s226_s3, [#allocation3]  }
  0xea   :  { %167 = dma.done.wait [#allocation3], 32  }
  0xeb   :  { %168 = vsyncadd [#allocation3], 4294967264 }
  0xec   :  { %116 = vsyncpa [#allocation3], 1 }

</bundles_post_ra>
